<compile_context>
chip_gen: v6e
topology: v6e:2x2x1
jax: 0.10.0
libtpu: 0.0.40
codegen_flags: <defaults>
</compile_context>

<pallas_src>
import functools

import jax
import jax.numpy as jnp
from jax.experimental import pallas as pl
from jax.experimental.pallas import tpu as pltpu


def _round_up(x, m):
    return ((x + m - 1) // m) * m


def _down_conv_kernel(w_ref, b_ref, p_ref, o_ref):
    # w_ref: (Cout, K)      compute dtype  (constant index_map -> resident)
    # b_ref: (Cout, 1)      f32            (constant index_map -> resident)
    # p_ref: (K, tile_n)    compute dtype
    # o_ref: (Cout, tile_n) out dtype
    acc = jnp.dot(w_ref[...], p_ref[...], preferred_element_type=jnp.float32)
    acc = acc + b_ref[...]                    # f32 epilogue (no bf16 VPU on v5e)
    o_ref[...] = jnp.maximum(acc, 0.0).astype(o_ref.dtype)


def downsampling_conv_block(x, weight, bias, *, stride=2, tile_n=4096,
                            compute_dtype=jnp.bfloat16, out_dtype=None):
    """Forward pass of DownsamplingConvBlock (normalization='none').

    x:      [B, Cin, D, H, W]   (NCDHW, like PyTorch)
    weight: [Cout, Cin, s, s, s]
    bias:   [Cout]
    returns [B, Cout, D//s, H//s, W//s]
    """
    B, Cin, D, H, W = x.shape
    Cout = weight.shape[0]
    s = stride
    assert D % s == 0 and H % s == 0 and W % s == 0
    Do, Ho, Wo = D // s, H // s, W // s
    K = Cin * s * s * s
    N = Do * Ho * Wo
    out_dtype = x.dtype if out_dtype is None else out_dtype

    # ---- glue: non-overlapping s^3 patches, channels-major (K, N) per batch.
    # K order = (Cin, kd, kh, kw), matching weight.reshape(Cout, K).
    # TODO(synk): this transpose is an extra HBM pass (see header note).
    xp = x.reshape(B, Cin, Do, s, Ho, s, Wo, s)
    xp = jnp.transpose(xp, (0, 1, 3, 5, 7, 2, 4, 6))      # (B, Cin, s,s,s, Do,Ho,Wo)
    patches = xp.reshape(B, K, N).astype(compute_dtype)

    w2d = weight.reshape(Cout, K).astype(compute_dtype)    # (Cout, K)
    b2d = bias.astype(jnp.float32).reshape(Cout, 1)        # f32 epilogue operand

    in_b = jnp.dtype(compute_dtype).itemsize
    out_b = jnp.dtype(out_dtype).itemsize

    # ---- generation-aware VMEM budget (v5e/v6e: 128 MiB, v7x: 64 MiB) ----------
    try:
        vmem_cap = int(pltpu.get_tpu_info().vmem_capacity_bytes)
    except Exception:
        vmem_cap = 64 * 1024 * 1024          # conservative fallback (v7x)

    def vmem_bytes(tn):
        return (2 * K * tn * in_b            # patch tile, double-buffered
                + 2 * Cout * tn * out_b      # output tile, double-buffered
                + Cout * tn * 4              # f32 matmul result
                + 2 * Cout * K * in_b        # weight (+ spare pipeline buffer)
                + 2 * Cout * 4)              # bias

    # ---- tile_n selection: lane-dense (multiple of 128) spatial tiles ----------
    if N <= 128:
        tile_n = N                           # full (legal) block, single step / batch
    else:
        tile_n = min(int(tile_n), max(128, (N // 128) * 128))
        tile_n = max(128, (tile_n // 128) * 128)
        # v7x megacore: aim for >= 8 total grid steps (>= 4 per TensorCore) so the
        # double-buffered DMA actually overlaps with compute.
        want_blocks = max(1, -(-8 // B))                       # ceil(8 / B)
        tile_n = min(tile_n, max(128, _round_up(pl.cdiv(N, want_blocks), 128)))
        # shrink to the hardware VMEM budget (~35% of capacity for tiles).
        budget = int(0.35 * vmem_cap)
        while tile_n > 128 and vmem_bytes(tile_n) > budget:
            tile_n = max(128, ((tile_n // 2) // 128) * 128)

    grid_n = pl.cdiv(N, tile_n)              # ragged tail masked on writeback
    vmem_limit = int(min(0.625 * vmem_cap,                      # ~40 MiB on v7x
                         max(32 * 1024 * 1024, 2 * vmem_bytes(tile_n))))

    cost = pl.CostEstimate(
        flops=2 * B * N * K * Cout,
        transcendentals=0,
        bytes_accessed=(B * K * N * in_b       # patch matrix read
                        + Cout * K * in_b      # weights
                        + Cout * 4             # bias
                        + B * Cout * N * out_b),  # output write (unpadded)
    )

    out = pl.pallas_call(
        _down_conv_kernel,
        out_shape=jax.ShapeDtypeStruct((B, Cout, N), out_dtype),
        grid_spec=pltpu.PrefetchScalarGridSpec(
            num_scalar_prefetch=0,
            grid=(B, grid_n),
            in_specs=[
                # weight / bias: constant index_map -> block resident across the
                # whole grid.  (pl.Buffered(1) would drop the spare pipeline
                # buffer, but the footprint is <= ~1 MiB, so default pipelining
                # is kept for lowering robustness.)
                pl.BlockSpec((Cout, K), lambda b, i: (0, 0)),
                pl.BlockSpec((Cout, 1), lambda b, i: (0, 0)),
                pl.BlockSpec((None, K, tile_n), lambda b, i: (b, 0, i)),
            ],
            out_specs=pl.BlockSpec((None, Cout, tile_n), lambda b, i: (b, 0, i)),
        ),
        compiler_params=pltpu.CompilerParams(
            dimension_semantics=("parallel", "parallel"),   # megacore-shardable
            vmem_limit_bytes=vmem_limit,
        ),
        cost_estimate=cost,
    )(w2d, b2d, patches)

    # Channels-major result: free reshape back to NCDHW (no transpose, no de-pad).
    return out.reshape(B, Cout, Do, Ho, Wo)


def _reference(x, weight, bias, stride=2):
    # plain-JAX reference: strided conv + bias + ReLU (f32, highest precision)
    y = jax.lax.conv_general_dilated(
        x, weight, window_strides=(stride,) * 3, padding="VALID",
        dimension_numbers=("NCDHW", "OIDHW", "NCDHW"),
        precision=jax.lax.Precision.HIGHEST)
    y = y + bias.reshape(1, -1, 1, 1, 1)
    return jnp.maximum(y, 0.0)


if __name__ == "__main__":
    key = jax.random.PRNGKey(0)
    k_x, k_w, k_b = jax.random.split(key, 3)

    B, Cin, Cout, S, stride = 2, 4, 16, 16, 2
    x = jax.random.normal(k_x, (B, Cin, S, S, S), dtype=jnp.float32)

    # Deterministic parameter init (PyTorch-like uniform fan-in scaling).
    fan_in = Cin * stride ** 3
    bound = 1.0 / (fan_in ** 0.5)
    weight = jax.random.uniform(k_w, (Cout, Cin, stride, stride, stride),
                                minval=-bound, maxval=bound, dtype=jnp.float32)
    bias = jax.random.uniform(k_b, (Cout,), minval=-bound, maxval=bound,
                              dtype=jnp.float32)

    y_ref = _reference(x, weight, bias, stride)

    # Default path: bf16 operands, f32 accumulation (relaxed tolerance).
    fwd = jax.jit(functools.partial(downsampling_conv_block, stride=stride))
    y = jax.block_until_ready(fwd(x, weight, bias))
    assert y.shape == (B, Cout, S // stride, S // stride, S // stride)
    assert jnp.allclose(y, y_ref, atol=3e-2, rtol=3e-2), float(
        jnp.max(jnp.abs(y - y_ref)))

    # float32 escape hatch: close to the PyTorch f32 Conv3d.
    fwd32 = jax.jit(functools.partial(downsampling_conv_block, stride=stride,
                                      compute_dtype=jnp.float32))
    y32 = jax.block_until_ready(fwd32(x, weight, bias))
    assert jnp.allclose(y32, y_ref, atol=5e-3, rtol=5e-3), float(
        jnp.max(jnp.abs(y32 - y_ref)))

    print("KERNEL_OK")
</pallas_src>

<mosaic_0001>
module attributes {stable_mosaic.version = 11 : i64} {
  func.func @_down_conv_kernel(%arg0: i32, %arg1: i32, %arg2: memref<16x32xbf16, #tpu.memory_space<vmem>>, %arg3: memref<16x1xf32, #tpu.memory_space<vmem>>, %arg4: memref<1x32x128xbf16, #tpu.memory_space<vmem>>, %arg5: memref<1x16x128xf32, #tpu.memory_space<vmem>>) attributes {dimension_semantics = [#tpu.dimension_semantics<parallel>, #tpu.dimension_semantics<parallel>], iteration_bounds = array<i64: 2, 4>, scalar_prefetch = 0 : i64, scratch_operands = 0 : i64, tpu.core_type = #tpu.core_type<tc>, window_params = [{pipeline_mode = #tpu.pipeline_mode<synchronous>, transform_indices = @transform_0, window_bounds = array<i64: 16, 32>}, {pipeline_mode = #tpu.pipeline_mode<synchronous>, transform_indices = @transform_1, window_bounds = array<i64: 16, 1>}, {transform_indices = @transform_2, window_bounds = array<i64: 1, 32, 128>}, {transform_indices = @transform_3, window_bounds = array<i64: 1, 16, 128>}]} {
    %c0 = arith.constant 0 : index
    %c0_0 = arith.constant 0 : index
    %0 = vector.load %arg2[%c0, %c0_0] : memref<16x32xbf16, #tpu.memory_space<vmem>>, vector<16x32xbf16>
    %c0_1 = arith.constant 0 : index
    %c0_2 = arith.constant 0 : index
    %c0_3 = arith.constant 0 : index
    %1 = vector.load %arg4[%c0_1, %c0_2, %c0_3] : memref<1x32x128xbf16, #tpu.memory_space<vmem>>, vector<1x32x128xbf16>
    %2 = vector.shape_cast %1 : vector<1x32x128xbf16> to vector<32x128xbf16>
    %cst = arith.constant dense<0.000000e+00> : vector<16x128xf32>
    %3 = tpu.matmul %0, %2, %cst {dimension_numbers = #tpu.dot_dimension_numbers<[1], [0], [0], [1], [0, 0, 1, 1], [], []>} : vector<16x32xbf16>, vector<32x128xbf16>, vector<16x128xf32> -> vector<16x128xf32>
    %c0_4 = arith.constant 0 : index
    %c0_5 = arith.constant 0 : index
    %4 = vector.load %arg3[%c0_4, %c0_5] : memref<16x1xf32, #tpu.memory_space<vmem>>, vector<16x1xf32>
    %5 = vector.broadcast %4 : vector<16x1xf32> to vector<16x128xf32>
    %6 = arith.addf %3, %5 : vector<16x128xf32>
    %cst_6 = arith.constant 0.000000e+00 : f32
    %7 = vector.broadcast %cst_6 : f32 to vector<16x128xf32>
    %8 = arith.maximumf %6, %7 : vector<16x128xf32>
    %c0_7 = arith.constant 0 : index
    %c0_8 = arith.constant 0 : index
    %c0_9 = arith.constant 0 : index
    %9 = vector.load %arg5[%c0_7, %c0_8, %c0_9] : memref<1x16x128xf32, #tpu.memory_space<vmem>>, vector<1x16x128xf32>
    %10 = vector.shape_cast %9 : vector<1x16x128xf32> to vector<16x128xf32>
    %11 = vector.shape_cast %8 : vector<16x128xf32> to vector<1x16x128xf32>
    tpu.vector_store %arg5[%c0_7, %c0_8, %c0_9], %11 {strides = array<i32>} : memref<1x16x128xf32, #tpu.memory_space<vmem>>, vector<1x16x128xf32>,
    return
  }
  func.func @transform_0(%arg0: i32, %arg1: i32) -> (i32, i32) {
    %c0_i32 = arith.constant 0 : i32
    %c0_i32_0 = arith.constant 0 : i32
    %c0_i32_1 = arith.constant 0 : i32
    return %c0_i32, %c0_i32_0 : i32, i32
  }
  func.func @transform_1(%arg0: i32, %arg1: i32) -> (i32, i32) {
    %c0_i32 = arith.constant 0 : i32
    %c0_i32_0 = arith.constant 0 : i32
    %c0_i32_1 = arith.constant 0 : i32
    return %c0_i32, %c0_i32_0 : i32, i32
  }
  func.func @transform_2(%arg0: i32, %arg1: i32) -> (i32, i32, i32) {
    %c0_i32 = arith.constant 0 : i32
    %c0_i32_0 = arith.constant 0 : i32
    return %arg0, %c0_i32, %arg1 : i32, i32, i32
  }
  func.func @transform_3(%arg0: i32, %arg1: i32) -> (i32, i32, i32) {
    %c0_i32 = arith.constant 0 : i32
    %c0_i32_0 = arith.constant 0 : i32
    return %arg0, %c0_i32, %arg1 : i32, i32, i32
  }
}

</mosaic_0001>

<bundles_post_ra>
// kernel: downsampling_conv_block.1
= control target key start
LH: loop header
LB: loop body
LE: loop exit
PB: predicated region body
PF: predicated region fallthrough
CT: control target
= control target key end

     0   :  { %s615_s12 = smov 0   ;;  %s617_s13 = smov 0   ;;  %s720_s0 = inlined_call_operand.vmem [shape: bf16[16,32], index: 0, kind: input, shape index: {}]   ;;  %s721_s1 = inlined_call_operand.vmem [shape: f32[16,1], index: 1, kind: input, shape index: {}]   ;;  %s722_s2 = inlined_call_operand.vmem [shape: bf16[2,32,512], index: 2, kind: input, shape index: {}]   ;;  %s723_s3 = inlined_call_operand.vmem [shape: f32[2,16,512], index: 3, kind: output, shape index: {}]  }
   0x1   :  { %s619_s14 = smov 0   ;;  %s621_s15 = smov 0  }
   0x2   :  { %s623_s16 = smov 0   ;;  %s625_s17 = smov 0  }
   0x3   :  { %s627_s18 = smov 0  }
   0x4 LB: > { %s22_s19 = sadd.s32 1, %s582_s16  ;;  %s25_s20 = sadd.s32 1, %s586_s17  ;;  %s590_s18 = sphi %s627_s18, %s13_s18   ;;  %s586_s17 = sphi %s625_s17, %s730_s17   ;;  %s582_s16 = sphi %s623_s16, %s729_s16   ;;  %s578_s15 = sphi %s621_s15, %s728_s15   ;;  %s574_s14 = sphi %s619_s14, %s727_s14   ;;  %s570_s13 = sphi %s617_s13, %s726_s13   ;;  %s566_s12 = sphi %s615_s12, %s725_s12  }
   0x5   : > { %p23_p0 = scmp.ge.s32.totalorder %s22_s19, 4  ;;  %s443_s21 = sadd.s32 4294967295, %s590_s18  }
   0x6   : > { %p83_p1 = scmp.ne.s32.totalorder %s570_s13, %s566_s12  ;;  %p84_p2 = scmp.eq.s32.totalorder %s590_s18, 0 }
   0x7   : > { %s732_s19 = smov (%p23_p0, %s22_s19), 0  ;;  %s734_s20 = smov (!%p23_p0, %s25_s20), %s586_s17 }
   0x8   : > { %p27_p3 = scmp.ge.s32.totalorder %s734_s20, 2  ;;  %p115_p4 = scmp.eq.s32.totalorder %s443_s21, 7 }
   0x9   : > { %s72_s22 = ssub.s32 %s582_s16, %s732_s19  ;;  %p85_p5 = por %p84_p2, %p83_p1 }
   0xa   : > { %s736_s20 = smov (%p27_p3, %s734_s20), 0  ;;  %p663_p6 = por %p115_p4, %p83_p1 }
   0xb   : > { %s71_s24 = ssub.s32 %s586_s17, %s736_s20  ;;  %s76_s26 = sadd.s32 1, %s570_s13 }
   0xc   : > { %s73_s25 = sor.u32 %s72_s22, %s71_s24  ;;  %p446_p8 = scmp.ge.s32.totalorder %s590_s18, 8 }
   0xd   : > { %p74_p7 = scmp.eq.s32.totalorder %s73_s25, 0 }
   0xe   : > { %143 = sbr.rel (%p446_p8) target bundleno = 28 (0x1c), region = 24 }
   0xf   : > { %s671_s27 = scalar_select %p74_p7, %s570_s13, %s76_s26  }
  0x13   : > { %146 = sbr.rel (!%p85_p5) target bundleno = 28 (0x1c), region = 28  ;;  %s148_s28 = sand.u32 (%p85_p5), 1, %s570_s13  }
  0x14   : > { %s448_s29 = sshll.u32 (%p85_p5), %s586_s17, 4  ;;  %s447_s30 = sshll.u32 (%p85_p5), %s148_s28, 4 }
  0x15   : > { %s152_s4 = sadd.s32 (%p85_p5), %s582_s16, %s448_s29  ;;  %s150_s9 = scalar_lea.vmem (%p85_p5), [#allocation2], %s447_s30 }
  0x16   : > { %s449_s5 = sshll.u32 (%p85_p5), %s152_s4, 2 }
  0x17   : > { %s154_s8 = scalar_lea.vmem (%p85_p5), %s722_s2, %s449_s5 }
  0x18   : > { %v171_v0 = vld [vmem:[%s154_s8] sm:$0xf]  ;;  %v173_v1 = vld [vmem:[%s154_s8 + $0x10] sm:$0xf] }
  0x19   : > { %v175_v2 = vld [vmem:[%s154_s8 + $0x20] sm:$0xf]  ;;  %172 = vst [vmem:[%s150_s9] sm:$0xf] %v171_v0  ;;  %174 = vst [vmem:[%s150_s9 + $0x4] sm:$0xf] %v173_v1 }
  0x1a   : > { %176 = vst [vmem:[%s150_s9 + $0x8] sm:$0xf] %v175_v2  ;;  %v177_v3 = vld [vmem:[%s154_s8 + $0x30] sm:$0xf] }
  0x1b   : > { %178 = vst [vmem:[%s150_s9 + $0xc] sm:$0xf] %v177_v3 }
  0x1c PF: > { %p450_p9 = scmp.ge.s32.totalorder %s590_s18, 1  ;;  %p209_p10 = scmp.lt.s32.totalorder %s590_s18, 9 }
  0x1e   : > { %p210_p11 = pnand %p450_p9, %p209_p10 }
  0x1f   : > { %s216_s10 = sand.u32 (!%p210_p11), 1, %s566_s12  }
  0x20   : > { %213 = sbr.rel (%p210_p11) target bundleno = 256 (0x100), region = 69  ;;  %s451_s11 = sshll.u32 (!%p210_p11), %s216_s10, 4 }
  0x21   : > { %s218_s24 = scalar_lea.vmem (!%p210_p11), [#allocation2], %s451_s11  ;;  %s237_s29 = scalar_lea.vmem (!%p210_p11), [#allocation3], %s451_s11 }
  0x25   : > { %v592_v4 = vmov 0.0   ;;  %vm593_vm0 = vmmov 0   ;;  %v245_v5 = vld [vmem:[%s721_s1] sm:$0xff]  ;;  %v594_v6 = vmov 0   ;;  %v533_v7 = vld [vmem:[%s218_s24 + $0x8] sm:$0xff]   ;;  %vm274_vm1 = vcmask 261120  }
  0x26   : > { %465 = vmatprep.subr.bf16.mxu0 %v592_v4  ;;  %469 = vmatprep.mubr.msk.bf16.mxu0 %vm593_vm0, %v592_v4  ;;  %v246_v8 = vld [vmem:[%s721_s1 + $0x8] sm:$0xff]  ;;  %v534_v9 = vld [vmem:[%s218_s24] sm:$0xff]   ;;  %s458_s30 = sshll.u32 (%p663_p6), %s578_s15, 3 }
  0x27   : > { %532 = vset.pattern.permute.xlu0 %v594_v6  ;;  %466 = vmatpush3.bf16.msra.mxu0 %v533_v7  ;;  %v535_v10 = vld [vmem:[%s720_s0] sm:$0xff]   ;;  %s331_s4 = sadd.s32 (%p663_p6), %s574_s14, %s458_s30 }
  0x28   : > { %249 = vperm.xlu0 %532, %v245_v5   ;;  %467 = vmatprep.subr.bf16.mxu0 %v592_v4  ;;  %s459_s5 = sshll.u32 (%p663_p6), %s331_s4, 3 }
  0x29   : > { %s333_s8 = scalar_lea.vmem (%p663_p6), %s723_s3, %s459_s5 }
  0x2b   : > { %468 = vmatpush3.bf16.msra.mxu0 %v534_v9 }
  0x2c   : > { %254 = vperm.xlu0 %532, %v246_v8  }
  0x2e   : > { %470 = vmatmul.mubr.msk.bf16.vlgmr.msra.gmra.mxu0 %vm274_vm1, %v535_v10 }
  0xa3   : > { %v250_v11 = vpop.permute.xlu0 %249 }
  0xa7   : > { %v255_v16 = vpop.permute.xlu0 %254 }
  0xee   : > { %v312_v12 = vpop.f32.mrf.mxu0 }
  0xef   : > { %v313_v13 = vadd.f32 %v312_v12, %v250_v11 }
  0xf0   : > { %v471_v14 = vpop.f32.mrf.mxu0 }
  0xf1   : > { %v319_v15 = vmax.f32 %v313_v13, 0.0 }
  0xf2   : > { %v315_v17 = vpop.f32.mrf.mxu0 }
  0xf3   : > { %321 = vst [vmem:[%s237_s29] sm:$0xff] %v319_v15  ;;  %v316_v18 = vadd.f32 %v315_v17, %v255_v16  ;;  %329 = sbr.rel (!%p663_p6) target bundleno = 256 (0x100), region = 77 }
  0xf4   : > { %v472_v19 = vpop.f32.mrf.mxu0 }
  0xf5   : > { %v320_v20 = vmax.f32 %v316_v18, 0.0 }
  0xf7   : > { %322 = vst [vmem:[%s237_s29 + $0x8] sm:$0xff] %v320_v20 }
  0xfa   : > { %v364_v21 = vld [vmem:[%s237_s29] sm:$0xff] }
  0xfb   : > { %365 = vst [vmem:[%s333_s8] sm:$0xff] %v364_v21 }
  0xfe   : > { %v366_v22 = vld [vmem:[%s237_s29 + $0x8] sm:$0xff] }
  0xff   : > { %367 = vst [vmem:[%s333_s8 + $0x20] sm:$0xff] %v366_v22 }
 0x100 PF: > { %s13_s18 = sadd.s32 1, %s590_s18   ;;  %s725_s12 = smov %s570_s13 }
 0x101   : > { %p10_p12 = scmp.ge.s32.totalorder %s13_s18, 10   ;;  %s726_s13 = smov %s671_s27 }
 0x102   : > { %s727_s14 = smov %s582_s16  ;;  %s728_s15 = smov %s586_s17 }
 0x103   : > { %s729_s16 = smov %s732_s19  ;;  %s730_s17 = smov %s736_s20 }
 0x104   :  { %12 = sbr.rel (!%p10_p12) target bundleno = 4 (0x4), region = 146 }

</bundles_post_ra>
